<compile_context>
chip_gen: v7x
topology: tpu7x:2x2x1
jax: 0.10.0
libtpu: 0.0.40
codegen_flags: <defaults>
</compile_context>

<pallas_src>
import functools

import jax
import jax.numpy as jnp
from jax import lax
from jax.experimental import pallas as pl
from jax.experimental.pallas import tpu as pltpu

LANE = 128
_UNROLL = 8                    # rows issued per unrolled loop step
_TN_MAX = 1024                 # max token tile; table rows padded to >= this
_SMEM_IDS_LIMIT = 128 * 1024   # bytes allowed for the scalar-prefetched ids


# ----------------------------- module glue ----------------------------------

def clean_cutoffs(cutoffs, n_token):
    """Mirror of AdaptiveEmbedding.clean_cutoffs (pure Python, static)."""
    if cutoffs is None:
        cutoffs = [19997, 39997, 199997, n_token]
    cutoffs = list(cutoffs)
    if not cutoffs:
        cutoffs = [n_token]
    last_co, c = cutoffs[0], 1
    while c < len(cutoffs):
        assert cutoffs[c] > last_co, f"cutoff at {c} is <= {c - 1}"
        last_co = cutoffs[c]
        if cutoffs[c] > n_token:
            break
        c += 1
    cutoffs = cutoffs[:c]
    if cutoffs[-1] > n_token:
        cutoffs[-1] = n_token
    if cutoffs[-1] < n_token:
        cutoffs.append(n_token)
    return cutoffs


def _round_up(x, m):
    return (x + m - 1) // m * m


# --------------------------- one-time table fold ------------------------------

def fold_effective_table(tables, projs, d_proj):
    """Pre-fold (lookup -> F.linear -> *emb_scale) into one bf16 gather table.

    Returns the table packed 2xbf16 -> uint32 (shape (n_rows, d_pad//2)) so
    per-row DMAs stay at 32-bit granularity.  Call ONCE at init and cache it;
    the forward is then a pure row gather with zero FLOPs.  Also covers
    div_val == 1 (single table; pass its projection, or None for identity).
    """
    emb_scale = float(d_proj) ** 0.5
    d_pad = _round_up(d_proj, LANE)
    chunks = []
    for t, w in zip(tables, projs):
        t = t.astype(jnp.float32)
        if w is None:
            eff = t * emb_scale                          # div_val==1, d_proj==d_embed
        else:
            eff = jnp.dot(t, w.astype(jnp.float32).T,
                          precision=lax.Precision.HIGHEST) * emb_scale
        eff = eff.astype(jnp.bfloat16)
        if eff.shape[1] != d_pad:
            eff = jnp.pad(eff, ((0, 0), (0, d_pad - eff.shape[1])))
        chunks.append(eff)
    eff = jnp.concatenate(chunks, axis=0)
    n_token = eff.shape[0]
    # Pad rows to a sublane multiple AND to >= the max token tile so the
    # aggregate-wait descriptor (shape (tn, dw)) is always in bounds.
    n_rows = max(_round_up(n_token, 8), _TN_MAX)
    if n_rows != n_token:
        eff = jnp.pad(eff, ((0, n_rows - n_token), (0, 0)))
    packed = lax.bitcast_convert_type(
        eff.reshape(n_rows, d_pad // 2, 2), jnp.uint32)   # (n_rows, d_pad//2)
    return packed, n_token, d_pad


# ------------------------------ Pallas kernel --------------------------------

def _gather_rows_kernel(ids_ref, tab_ref, out_ref, sem, *, tn):
    """Pure row gather: out[j, :] = packed_table[ids[base + j], :].

    ids_ref : SMEM (n_pad,) int32        scalar-prefetched, clipped token ids
    tab_ref : HBM  (n_rows, dw) uint32   folded table (2 bf16 packed per u32)
    out_ref : VMEM (tn, dw)    uint32    output block; rows are DMA'd straight in
    sem     : DMA semaphore shared by all row copies of this tile
    """
    base = pl.multiple_of(pl.program_id(0) * tn, tn)

    # Issue all per-row DMAs (HBM row -> output row), _UNROLL per loop step so
    # scalar id reads / address math co-issue with the descriptor pushes.
    @pl.loop(0, tn // _UNROLL)
    def _issue(step):
        j0 = pl.multiple_of(step * _UNROLL, _UNROLL)
        for u in range(_UNROLL):
            j = j0 + u
            row = ids_ref[base + j]
            pltpu.make_async_copy(
                tab_ref.at[pl.ds(row, 1), :],
                out_ref.at[pl.ds(j, 1), :],
                sem,
            ).start()

    # Single aggregate wait: DMA-semaphore accounting is byte based and every
    # row copy above is the same size, so one descriptor covering the whole
    # (tn, dw) output block accounts for all tn copies.
    pltpu.make_async_copy(tab_ref.at[pl.ds(0, tn), :], out_ref, sem).wait()


# -------------------------------- forward ------------------------------------

def adaptive_embedding_fwd(inp, packed_table, n_token, d_proj, *, tn=None):
    """inp: (batch, seq) int32 token ids -> (batch, seq, d_proj) bfloat16.

    `packed_table` comes from fold_effective_table (cache it across calls).
    """
    batch, seq = inp.shape
    n = batch * seq
    n_rows, dw = packed_table.shape
    d_pad = dw * 2

    if tn is None:
        # Largest tile <= _TN_MAX that still gives >= 2 grid steps (the
        # "parallel" grid axis is split across v7x's 2 TensorCores).
        tn = min(_TN_MAX, _round_up(pl.cdiv(n, 2), _UNROLL))
    tn = max(_UNROLL, _round_up(tn, _UNROLL))
    assert tn <= n_rows, "token tile larger than (padded) table rows"

    n_pad = _round_up(n, tn)
    assert n_pad * 4 <= _SMEM_IDS_LIMIT, (
        "ids array too large for whole-array scalar prefetch; reduce batch*seq")
    # TODO(synk): for very large batch*seq, switch ids to a per-tile SMEM block
    # ((tn,), lambda i: (i,)) instead of scalar-prefetching the whole array.

    ids = inp.reshape(-1).astype(jnp.int32)
    # nn.Embedding raises on out-of-range ids; here they are clipped so the
    # row-gather DMA stays in bounds (explicit contract change).
    ids = jnp.clip(ids, 0, n_token - 1)
    if n_pad != n:
        ids = jnp.pad(ids, (0, n_pad - n))

    bytes_accessed = n_pad * 4 + 2 * n_pad * dw * 4   # ids + table reads + writeback

    out_packed = pl.pallas_call(
        functools.partial(_gather_rows_kernel, tn=tn),
        out_shape=jax.ShapeDtypeStruct((n_pad, dw), jnp.uint32),
        grid_spec=pltpu.PrefetchScalarGridSpec(
            num_scalar_prefetch=1,
            grid=(n_pad // tn,),
            in_specs=[pl.BlockSpec(memory_space=pl.ANY)],   # table stays in HBM
            out_specs=pl.BlockSpec((tn, dw), lambda i, ids: (i, 0)),
            scratch_shapes=[pltpu.SemaphoreType.DMA(())],
        ),
        compiler_params=pltpu.CompilerParams(
            dimension_semantics=("parallel",)),             # megacore on v7x
        cost_estimate=pl.CostEstimate(flops=0, transcendentals=0,
                                      bytes_accessed=int(bytes_accessed)),
    )(ids, packed_table)

    # TODO(synk): on v5e/v6e (128 MiB VMEM) a bf16 table that fits could be kept
    # VMEM-resident and gathered with on-chip loads instead of per-row HBM DMAs;
    # on v7x, only the head cluster could be pinned.  Not implemented here.

    out = lax.bitcast_convert_type(out_packed, jnp.bfloat16).reshape(n_pad, d_pad)
    out = out[:n, :d_proj]     # no-op when tn | n and d_proj is a multiple of 128
    return out.reshape(batch, seq, d_proj)


# ------------------------------ reference ------------------------------------

def adaptive_embedding_ref(inp, tables, projs, cutoff_ends, d_proj):
    """fp32 reference matching the PyTorch forward (div_val > 1 path)."""
    flat = inp.reshape(-1)
    out = jnp.zeros((flat.shape[0], d_proj), jnp.float32)
    for i in range(len(cutoff_ends) - 1):
        l_idx, r_idx = cutoff_ends[i], cutoff_ends[i + 1]
        mask = (flat >= l_idx) & (flat < r_idx)
        rel = jnp.clip(flat - l_idx, 0, r_idx - l_idx - 1)
        emb = jnp.take(tables[i], rel, axis=0)
        proj = jnp.dot(emb, projs[i].T, precision=lax.Precision.HIGHEST)
        out = out + jnp.where(mask[:, None], proj, 0.0)
    out = out * (float(d_proj) ** 0.5)
    return out.reshape(*inp.shape, d_proj)


# --------------------------------- main ---------------------------------------

if __name__ == "__main__":
    # Synthetic AdaptiveEmbedding config (div_val > 1 adaptive path).
    n_token = 512
    d_embed = 128
    d_proj = 128                                    # multiple of 128 -> no pad
    div_val = 2
    cutoffs = clean_cutoffs([128, 256], n_token)    # -> [128, 256, 512]
    cutoff_ends = [0] + cutoffs                     # -> [0, 128, 256, 512]

    batch, seq = 8, 256                             # N = 2048 tokens -> 2 tiles of 1024

    key = jax.random.PRNGKey(0)
    tables, projs = [], []
    for i in range(len(cutoffs)):
        l_idx, r_idx = cutoff_ends[i], cutoff_ends[i + 1]
        d_emb_i = d_embed // div_val ** i
        key, k1, k2 = jax.random.split(key, 3)
        # nn.Embedding default init ~ N(0,1); projections random (not torch's
        # .zero_()) so the test is non-trivial.
        tables.append(jax.random.normal(k1, (r_idx - l_idx, d_emb_i), jnp.float32))
        projs.append(0.02 * jax.random.normal(k2, (d_proj, d_emb_i), jnp.float32))

    key, k_inp = jax.random.split(key)
    inp = jax.random.randint(k_inp, (batch, seq), 0, n_token, dtype=jnp.int32)

    # One-time init: fold lookup -> projection -> *emb_scale into a gather table.
    packed_table, _, d_pad = fold_effective_table(tables, projs, d_proj)

    out = adaptive_embedding_fwd(inp, packed_table, n_token, d_proj)
    out = jax.block_until_ready(out)

    assert out.shape == (batch, seq, d_proj)
    assert out.dtype == jnp.bfloat16

    # Exact check of the gather itself against the same packed bf16 table.
    eff_bf16 = lax.bitcast_convert_type(packed_table, jnp.bfloat16)
    eff_bf16 = eff_bf16.reshape(packed_table.shape[0], d_pad)
    ids_clipped = jnp.clip(inp.reshape(-1), 0, n_token - 1)
    gather_ref = jnp.take(eff_bf16, ids_clipped, axis=0)[:, :d_proj]
    gather_ref = gather_ref.reshape(batch, seq, d_proj)
    assert jnp.array_equal(out, gather_ref), "gather mismatch vs packed table"

    # Loose check of the folded math against the fp32 module reference
    # (difference is only bf16 storage of the folded table).
    ref = adaptive_embedding_ref(inp, tables, projs, cutoff_ends, d_proj)
    assert jnp.allclose(out.astype(jnp.float32), ref, rtol=3e-2, atol=3e-2), \
        "mismatch vs fp32 adaptive-embedding reference"

    print("KERNEL_OK")
</pallas_src>

<mosaic_0001>
module attributes {stable_mosaic.version = 11 : i64} {
  func.func @_gather_rows_kernel(%arg0: i32, %arg1: memref<2048xi32, #tpu.memory_space<smem>>, %arg2: memref<1024x64xi32, #tpu.memory_space<any>>, %arg3: memref<1024x64xi32, #tpu.memory_space<vmem>>, %arg4: memref<!tpu.dma_semaphore, #tpu.memory_space<semaphore_mem>>) attributes {dimension_semantics = [#tpu.dimension_semantics<parallel>], iteration_bounds = array<i64: 2>, scalar_prefetch = 1 : i64, scratch_operands = 1 : i64, tpu.core_type = #tpu.core_type<tc>, window_params = [{}, {transform_indices = @transform_1, window_bounds = array<i64: 1024, 64>}]} {
    %c1024_i32 = arith.constant 1024 : i32
    %0 = arith.muli %arg0, %c1024_i32 : i32
    %1 = tpu.assume_multiple %0, 1024 : i32
    %c0_i32 = arith.constant 0 : i32
    %c128_i32 = arith.constant 128 : i32
    %2 = arith.addi %c0_i32, %c128_i32 : i32
    %c1_i32 = arith.constant 1 : i32
    scf.for %arg5 = %c0_i32 to %2 step %c1_i32  : i32 {
      %c1_i32_3 = arith.constant 1 : i32
      %4 = arith.muli %arg5, %c1_i32_3 : i32
      %c0_i32_4 = arith.constant 0 : i32
      %5 = arith.addi %c0_i32_4, %4 : i32
      %c8_i32 = arith.constant 8 : i32
      %6 = arith.muli %5, %c8_i32 : i32
      %7 = tpu.assume_multiple %6, 8 : i32
      %c0_i32_5 = arith.constant 0 : i32
      %8 = arith.addi %7, %c0_i32_5 : i32
      %9 = arith.addi %1, %8 : i32
      %10 = arith.index_cast %9 : i32 to index
      %11 = memref.load %arg1[%10] : memref<2048xi32, #tpu.memory_space<smem>>
      %c0_i32_6 = arith.constant 0 : i32
      %12 = tpu.memref_slice %arg2[%11, %c0_i32_6] : memref<1024x64xi32, #tpu.memory_space<any>> -> memref<1x64xi32, #tpu.memory_space<any>>
      %c0_i32_7 = arith.constant 0 : i32
      %13 = tpu.memref_slice %arg3[%8, %c0_i32_7] : memref<1024x64xi32, #tpu.memory_space<vmem>> -> memref<1x64xi32, #tpu.memory_space<vmem>>
      tpu.enqueue_dma source(%12 : memref<1x64xi32, #tpu.memory_space<any>>) target(%13 : memref<1x64xi32, #tpu.memory_space<vmem>>) target_semaphore(%arg4 : memref<!tpu.dma_semaphore, #tpu.memory_space<semaphore_mem>>)
      %c1_i32_8 = arith.constant 1 : i32
      %14 = arith.addi %7, %c1_i32_8 : i32
      %15 = arith.addi %1, %14 : i32
      %16 = arith.index_cast %15 : i32 to index
      %17 = memref.load %arg1[%16] : memref<2048xi32, #tpu.memory_space<smem>>
      %c0_i32_9 = arith.constant 0 : i32
      %18 = tpu.memref_slice %arg2[%17, %c0_i32_9] : memref<1024x64xi32, #tpu.memory_space<any>> -> memref<1x64xi32, #tpu.memory_space<any>>
      %c0_i32_10 = arith.constant 0 : i32
      %19 = tpu.memref_slice %arg3[%14, %c0_i32_10] : memref<1024x64xi32, #tpu.memory_space<vmem>> -> memref<1x64xi32, #tpu.memory_space<vmem>>
      tpu.enqueue_dma source(%18 : memref<1x64xi32, #tpu.memory_space<any>>) target(%19 : memref<1x64xi32, #tpu.memory_space<vmem>>) target_semaphore(%arg4 : memref<!tpu.dma_semaphore, #tpu.memory_space<semaphore_mem>>)
      %c2_i32 = arith.constant 2 : i32
      %20 = arith.addi %7, %c2_i32 : i32
      %21 = arith.addi %1, %20 : i32
      %22 = arith.index_cast %21 : i32 to index
      %23 = memref.load %arg1[%22] : memref<2048xi32, #tpu.memory_space<smem>>
      %c0_i32_11 = arith.constant 0 : i32
      %24 = tpu.memref_slice %arg2[%23, %c0_i32_11] : memref<1024x64xi32, #tpu.memory_space<any>> -> memref<1x64xi32, #tpu.memory_space<any>>
      %c0_i32_12 = arith.constant 0 : i32
      %25 = tpu.memref_slice %arg3[%20, %c0_i32_12] : memref<1024x64xi32, #tpu.memory_space<vmem>> -> memref<1x64xi32, #tpu.memory_space<vmem>>
      tpu.enqueue_dma source(%24 : memref<1x64xi32, #tpu.memory_space<any>>) target(%25 : memref<1x64xi32, #tpu.memory_space<vmem>>) target_semaphore(%arg4 : memref<!tpu.dma_semaphore, #tpu.memory_space<semaphore_mem>>)
      %c3_i32 = arith.constant 3 : i32
      %26 = arith.addi %7, %c3_i32 : i32
      %27 = arith.addi %1, %26 : i32
      %28 = arith.index_cast %27 : i32 to index
      %29 = memref.load %arg1[%28] : memref<2048xi32, #tpu.memory_space<smem>>
      %c0_i32_13 = arith.constant 0 : i32
      %30 = tpu.memref_slice %arg2[%29, %c0_i32_13] : memref<1024x64xi32, #tpu.memory_space<any>> -> memref<1x64xi32, #tpu.memory_space<any>>
      %c0_i32_14 = arith.constant 0 : i32
      %31 = tpu.memref_slice %arg3[%26, %c0_i32_14] : memref<1024x64xi32, #tpu.memory_space<vmem>> -> memref<1x64xi32, #tpu.memory_space<vmem>>
      tpu.enqueue_dma source(%30 : memref<1x64xi32, #tpu.memory_space<any>>) target(%31 : memref<1x64xi32, #tpu.memory_space<vmem>>) target_semaphore(%arg4 : memref<!tpu.dma_semaphore, #tpu.memory_space<semaphore_mem>>)
      %c4_i32 = arith.constant 4 : i32
      %32 = arith.addi %7, %c4_i32 : i32
      %33 = arith.addi %1, %32 : i32
      %34 = arith.index_cast %33 : i32 to index
      %35 = memref.load %arg1[%34] : memref<2048xi32, #tpu.memory_space<smem>>
      %c0_i32_15 = arith.constant 0 : i32
      %36 = tpu.memref_slice %arg2[%35, %c0_i32_15] : memref<1024x64xi32, #tpu.memory_space<any>> -> memref<1x64xi32, #tpu.memory_space<any>>
      %c0_i32_16 = arith.constant 0 : i32
      %37 = tpu.memref_slice %arg3[%32, %c0_i32_16] : memref<1024x64xi32, #tpu.memory_space<vmem>> -> memref<1x64xi32, #tpu.memory_space<vmem>>
      tpu.enqueue_dma source(%36 : memref<1x64xi32, #tpu.memory_space<any>>) target(%37 : memref<1x64xi32, #tpu.memory_space<vmem>>) target_semaphore(%arg4 : memref<!tpu.dma_semaphore, #tpu.memory_space<semaphore_mem>>)
      %c5_i32 = arith.constant 5 : i32
      %38 = arith.addi %7, %c5_i32 : i32
      %39 = arith.addi %1, %38 : i32
      %40 = arith.index_cast %39 : i32 to index
      %41 = memref.load %arg1[%40] : memref<2048xi32, #tpu.memory_space<smem>>
      %c0_i32_17 = arith.constant 0 : i32
      %42 = tpu.memref_slice %arg2[%41, %c0_i32_17] : memref<1024x64xi32, #tpu.memory_space<any>> -> memref<1x64xi32, #tpu.memory_space<any>>
      %c0_i32_18 = arith.constant 0 : i32
      %43 = tpu.memref_slice %arg3[%38, %c0_i32_18] : memref<1024x64xi32, #tpu.memory_space<vmem>> -> memref<1x64xi32, #tpu.memory_space<vmem>>
      tpu.enqueue_dma source(%42 : memref<1x64xi32, #tpu.memory_space<any>>) target(%43 : memref<1x64xi32, #tpu.memory_space<vmem>>) target_semaphore(%arg4 : memref<!tpu.dma_semaphore, #tpu.memory_space<semaphore_mem>>)
      %c6_i32 = arith.constant 6 : i32
      %44 = arith.addi %7, %c6_i32 : i32
      %45 = arith.addi %1, %44 : i32
      %46 = arith.index_cast %45 : i32 to index
      %47 = memref.load %arg1[%46] : memref<2048xi32, #tpu.memory_space<smem>>
      %c0_i32_19 = arith.constant 0 : i32
      %48 = tpu.memref_slice %arg2[%47, %c0_i32_19] : memref<1024x64xi32, #tpu.memory_space<any>> -> memref<1x64xi32, #tpu.memory_space<any>>
      %c0_i32_20 = arith.constant 0 : i32
      %49 = tpu.memref_slice %arg3[%44, %c0_i32_20] : memref<1024x64xi32, #tpu.memory_space<vmem>> -> memref<1x64xi32, #tpu.memory_space<vmem>>
      tpu.enqueue_dma source(%48 : memref<1x64xi32, #tpu.memory_space<any>>) target(%49 : memref<1x64xi32, #tpu.memory_space<vmem>>) target_semaphore(%arg4 : memref<!tpu.dma_semaphore, #tpu.memory_space<semaphore_mem>>)
      %c7_i32 = arith.constant 7 : i32
      %50 = arith.addi %7, %c7_i32 : i32
      %51 = arith.addi %1, %50 : i32
      %52 = arith.index_cast %51 : i32 to index
      %53 = memref.load %arg1[%52] : memref<2048xi32, #tpu.memory_space<smem>>
      %c0_i32_21 = arith.constant 0 : i32
      %54 = tpu.memref_slice %arg2[%53, %c0_i32_21] : memref<1024x64xi32, #tpu.memory_space<any>> -> memref<1x64xi32, #tpu.memory_space<any>>
      %c0_i32_22 = arith.constant 0 : i32
      %55 = tpu.memref_slice %arg3[%50, %c0_i32_22] : memref<1024x64xi32, #tpu.memory_space<vmem>> -> memref<1x64xi32, #tpu.memory_space<vmem>>
      tpu.enqueue_dma source(%54 : memref<1x64xi32, #tpu.memory_space<any>>) target(%55 : memref<1x64xi32, #tpu.memory_space<vmem>>) target_semaphore(%arg4 : memref<!tpu.dma_semaphore, #tpu.memory_space<semaphore_mem>>)
    }
    %c128_i32_0 = arith.constant 128 : i32
    %c0_i32_1 = arith.constant 0 : i32
    %c0_i32_2 = arith.constant 0 : i32
    %3 = tpu.memref_slice %arg2[%c0_i32_1, %c0_i32_2] : memref<1024x64xi32, #tpu.memory_space<any>> -> memref<1024x64xi32, #tpu.memory_space<any>>
    tpu.wait_dma2 semaphore(%arg4 : memref<!tpu.dma_semaphore, #tpu.memory_space<semaphore_mem>>) src(%3 : memref<1024x64xi32, #tpu.memory_space<any>>) dst(%arg3 : memref<1024x64xi32, #tpu.memory_space<vmem>>)
    return
  }
  func.func @transform_1(%arg0: i32, %arg1: memref<2048xi32, #tpu.memory_space<smem>>) -> (i32, i32) {
    %c0_i32 = arith.constant 0 : i32
    %c0_i32_0 = arith.constant 0 : i32
    return %arg0, %c0_i32 : i32, i32
  }
}

</mosaic_0001>

<bundles_post_ra>
// kernel: tpu_custom_call.1
= control target key start
LH: loop header
LB: loop body
LE: loop exit
PB: predicated region body
PF: predicated region fallthrough
CT: control target
= control target key end

     0   :  { %s809_s0 = inlined_call_operand.vmem [shape: s32[2048], index: 0, kind: input, shape index: {}]   ;;  %s810_s1 = inlined_call_operand.vmem [shape: u32[1024,64], index: 1, kind: input, shape index: {}]   ;;  %s811_s2 = inlined_call_operand.vmem [shape: u32[2048,64], index: 2, kind: output, shape index: {}]  }
   0x1   :  { %s7_s11 = sshll.u32 %s809_s0, 4  ;;  %s8_s11 = int_to_ptr.vmem [resolvable:$true] %s7_s11 }
   0x2   :  { %s677_s12 = scalar_lea.vmem %s8_s11, 256  ;;  %p682_p1 = scmp.lt.s32.totalorder %s8_s11, %s8_s11 }
   0x3   :  { %p678_p0 = scmp.ne.s32.totalorder %s8_s11, %s677_s12  ;;  %p683_p2 = scmp.lt.s32.totalorder %s677_s12, %s677_s12 }
   0x5   :  { %p684_p3 = por %p683_p2, %p682_p1 }
   0x7   :  { %p685_p4 = pnand %p684_p3, %p678_p0 }
   0x9   :  { %688 = shalt.err (!%p685_p4)  }
   0xa   :  { %s709_s13 = smov [#allocation4]  }
   0xb   :  { %10 = dma.vmem_to_smem %s8_s11, 256, %s709_s13, [#allocation3] }
   0xc   :  { %697 = dma.done.wait [#allocation3], 256 }
   0xd   :  { %698 = vsyncadd [#allocation3], 4294967040 }
   0xe   :  { %12 = sfence }
   0xf   :  { %s728_s14 = smov 0  }
  0x10 LB: > { %p631_p5 = scmp.ge.s32.totalorder %s703_s14, 2  ;;  %s703_s14 = sphi %s728_s14, %s18_s14  }
  0x11   : > { %s632_s0 = sshll.u32 (!%p631_p5), %s703_s14, 7  ;;  %s736_s15 = sshll.u32 (!%p631_p5), %s703_s14, 10 }
  0x12   : > { %43 = sbr.rel (%p631_p5) target bundleno = 128 (0x80), region = 12  ;;  %p52_p6 = scmp.lt.s32.totalorder (!%p631_p5), %s632_s0, 255 }
  0x13   : > { %s743_s20 = smov (!%p631_p5), 0  }
  0x19   : > { %s813_s0 = smov (!%p52_p6, %s632_s0), 255 }
  0x1a   : > { %s633_s16 = sshll.u32 %s813_s0, 3 }
  0x1b   : > { %s741_s19 = scalar_lea.vmem %s811_s2, %s633_s16 }
  0x1c LB: >> { %s749_s21 = sshll.u32 %s707_s20, 3  ;;  %s707_s20 = sphi %s743_s20, %s63_s20  }
  0x1d   : >> { %s65_s22 = sadd.s32 %s749_s21, %s736_s15  ;;  %s755_s24 = scalar_lea.vmem %s741_s19, %s749_s21 }
  0x1e   : >> { %s66_s23 = sld [smem:[#allocation4 + %s65_s22]] }
  0x24   : >> { %s67_s27 = scalar_lea.vmem %s810_s1, %s66_s23 }
  0x25   : >> { %v86_v0 = vld [vmem:[%s67_s27] sm:$0x1] }
  0x26   : >> { %87 = vst [vmem:[%s755_s24] sm:$0x1] %v86_v0 }
  0x27   : >> { %112 = vsyncadd [#allocation2], 16  ;;  %s113_s28 = sadd.s32 1, %s749_s21 }
  0x28   : >> { %s114_s29 = sadd.s32 %s736_s15, %s113_s28 }
  0x29   : >> { %s115_s30 = sld [smem:[#allocation4 + %s114_s29]] }
  0x2f   : >> { %s116_s5 = scalar_lea.vmem %s810_s1, %s115_s30 }
  0x30   : >> { %v135_v1 = vld [vmem:[%s116_s5] sm:$0x1] }
  0x31   : >> { %638 = vst [vmem:[%s755_s24 + $0x1] sm:$0x1] %v135_v1 }
  0x32   : >> { %161 = vsyncadd [#allocation2], 16  ;;  %s162_s6 = sadd.s32 2, %s749_s21 }
  0x33   : >> { %s163_s7 = sadd.s32 %s736_s15, %s162_s6 }
  0x34   : >> { %s164_s8 = sld [smem:[#allocation4 + %s163_s7]] }
  0x3a   : >> { %s165_s11 = scalar_lea.vmem %s810_s1, %s164_s8 }
  0x3b   : >> { %v184_v2 = vld [vmem:[%s165_s11] sm:$0x1] }
  0x3c   : >> { %641 = vst [vmem:[%s755_s24 + $0x2] sm:$0x1] %v184_v2 }
  0x3d   : >> { %210 = vsyncadd [#allocation2], 16  ;;  %s211_s12 = sadd.s32 3, %s749_s21 }
  0x3e   : >> { %s212_s13 = sadd.s32 %s736_s15, %s211_s12 }
  0x3f   : >> { %s213_s0 = sld [smem:[#allocation4 + %s212_s13]] }
  0x45   : >> { %s214_s18 = scalar_lea.vmem %s810_s1, %s213_s0 }
  0x46   : >> { %v233_v3 = vld [vmem:[%s214_s18] sm:$0x1] }
  0x47   : >> { %644 = vst [vmem:[%s755_s24 + $0x3] sm:$0x1] %v233_v3 }
  0x48   : >> { %259 = vsyncadd [#allocation2], 16  ;;  %s260_s22 = sadd.s32 4, %s749_s21 }
  0x49   : >> { %s261_s23 = sadd.s32 %s736_s15, %s260_s22 }
  0x4a   : >> { %s262_s25 = sld [smem:[#allocation4 + %s261_s23]] }
  0x50   : >> { %s263_s28 = scalar_lea.vmem %s810_s1, %s262_s25 }
  0x51   : >> { %v282_v4 = vld [vmem:[%s263_s28] sm:$0x1] }
  0x52   : >> { %647 = vst [vmem:[%s755_s24 + $0x4] sm:$0x1] %v282_v4 }
  0x53   : >> { %308 = vsyncadd [#allocation2], 16  ;;  %s309_s29 = sadd.s32 5, %s749_s21 }
  0x54   : >> { %s310_s30 = sadd.s32 %s736_s15, %s309_s29 }
  0x55   : >> { %s311_s3 = sld [smem:[#allocation4 + %s310_s30]] }
  0x5b   : >> { %s312_s6 = scalar_lea.vmem %s810_s1, %s311_s3 }
  0x5c   : >> { %v331_v5 = vld [vmem:[%s312_s6] sm:$0x1] }
  0x5d   : >> { %650 = vst [vmem:[%s755_s24 + $0x5] sm:$0x1] %v331_v5 }
  0x5e   : >> { %357 = vsyncadd [#allocation2], 16  ;;  %s358_s7 = sadd.s32 6, %s749_s21 }
  0x5f   : >> { %s359_s8 = sadd.s32 %s736_s15, %s358_s7 }
  0x60   : >> { %s360_s9 = sld [smem:[#allocation4 + %s359_s8]] }
  0x66   : >> { %s361_s12 = scalar_lea.vmem %s810_s1, %s360_s9 }
  0x67   : >> { %v380_v6 = vld [vmem:[%s361_s12] sm:$0x1] }
  0x68   : >> { %653 = vst [vmem:[%s755_s24 + $0x6] sm:$0x1] %v380_v6 }
  0x69   : >> { %406 = vsyncadd [#allocation2], 16  ;;  %s407_s13 = sadd.s32 7, %s749_s21 }
  0x6a   : >> { %s408_s0 = sadd.s32 %s736_s15, %s407_s13 }
  0x6b   : >> { %s409_s16 = sld [smem:[#allocation4 + %s408_s0]] }
  0x71   : >> { %s410_s22 = scalar_lea.vmem %s810_s1, %s409_s16 }
  0x72   : >> { %v429_v7 = vld [vmem:[%s410_s22] sm:$0x1] }
  0x73   : >> { %656 = vst [vmem:[%s755_s24 + $0x7] sm:$0x1] %v429_v7 }
  0x74   : >> { %455 = vsyncadd [#allocation2], 16  ;;  %s63_s20 = sadd.s32 1, %s707_s20  }
  0x75   : >> { %p60_p7 = scmp.ge.s32.totalorder %s63_s20, 128  }
  0x77   : > { %62 = sbr.rel (!%p60_p7) target bundleno = 28 (0x1c), region = 382 }
  0x7e   : > { %699 = dma.done.wait [#allocation2], 16384 }
  0x7f   : > { %700 = vsyncadd [#allocation2], 4294950912 }
  0x80 PF: > { %s18_s14 = sadd.s32 1, %s703_s14  }
  0x81   : > { %p15_p8 = scmp.ge.s32.totalorder %s18_s14, 3  }
  0x83   :  { %17 = sbr.rel (!%p15_p8) target bundleno = 16 (0x10), region = 393 }
  0x8a   :  { %481 = vsyncmov [#allocation2] }
  0x8d   :  { %s482_s21 = vpop.sfrf %481 }
  0x8e   :  { %p659_p9 = scmp.ne.s32.totalorder %s482_s21, 0 }
  0x90   :  { %486 = shalt.err (%p659_p9)  }

</bundles_post_ra>
